<compile_context>
chip_gen: v6e
topology: v6e:2x2x1
jax: 0.10.0
libtpu: 0.0.40
codegen_flags: <defaults>
</compile_context>

<pallas_src>
import jax
import jax.numpy as jnp
from jax.experimental import pallas as pl
from jax.experimental.pallas import tpu as pltpu


def _cdiv(a, b):
    return -(-a // b)


def _round_up(a, b):
    return _cdiv(a, b) * b


# ----------------------------------------------------------------------------
# Fused kernel: both sub T-models + head fusion + final sum, one batch tile
# ----------------------------------------------------------------------------
def _fused_split_t_kernel(bel_ref, pot_ref, w_top_ref, w_bot_ref,
                          b1_ref, w2_ref, o_ref):
    """h   = relu(bel @ W_top + pot @ W_bot + b1_packed)      (tb, Hp), f32
       obj = w2_packed @ h.T                                   (1, tb), lane-dense
    The output biases b2u+b2p live in a constant bias column of h."""
    h = jnp.dot(bel_ref[...], w_top_ref[...],
                preferred_element_type=jnp.float32)
    h = h + jnp.dot(pot_ref[...], w_bot_ref[...],
                    preferred_element_type=jnp.float32)
    h = jnp.maximum(h + b1_ref[...], 0.0)                   # f32 ReLU on VPU
    obj = jnp.dot(w2_ref[...], h.T,
                  preferred_element_type=jnp.float32)        # (1, tb)
    o_ref[...] = obj.astype(o_ref.dtype)


# ----------------------------------------------------------------------------
# InputSplitTModelV2 forward (use_unary=True, use_pair=True, no_t_pots=False)
# ----------------------------------------------------------------------------
def input_split_t_model_v2(beliefs, pots, inputs,
                           unary_params, pair_params, num_unary_pots,
                           *, block_b=2048, act_dtype=None):
    """Single fused pallas_call for the whole forward pass.

    `inputs` is accepted for API parity but unused by the MLP sub T-models.
    `act_dtype=jnp.bfloat16` enables the narrow-activation path (v6e/v7x).
    """
    # TODO(synk): only the default config (both sub-models, with pots) is
    # implemented; use_unary/use_pair-only and no_t_pots variants are not.
    del inputs  # unused by this sub T-model variant

    B, T = beliefs.shape
    U = int(num_unary_pots)
    P = T - U

    w1u, b1u, w2u, b2u = unary_params           # (2U,H) (1,H) (H,1) (1,1)
    w1p, b1p, w2p, b2p = pair_params            # (2P,H) (1,H) (H,1) (1,1)
    H = w1u.shape[1]

    # Shape sanity (review correctness concern): packed split must line up.
    assert w1u.shape[0] == 2 * U, (w1u.shape, U)
    assert w1p.shape[0] == 2 * P, (w1p.shape, P)
    assert w1p.shape[1] == H, (w1p.shape, H)

    # ---- pack both sub-models into one block first layer -------------------
    # hidden columns: [0..H-1] unary | [H..2H-1] pair | [2H] bias col | 0-pad
    Hp = max(128, _round_up(2 * H + 1, 128))

    w_top = jnp.zeros((T, Hp), jnp.float32)                 # multiplies beliefs
    w_top = w_top.at[:U, :H].set(w1u[:U].astype(jnp.float32))
    w_top = w_top.at[U:, H:2 * H].set(w1p[:P].astype(jnp.float32))
    w_bot = jnp.zeros((T, Hp), jnp.float32)                 # multiplies pots
    w_bot = w_bot.at[:U, :H].set(w1u[U:].astype(jnp.float32))
    w_bot = w_bot.at[U:, H:2 * H].set(w1p[P:].astype(jnp.float32))

    b1_packed = jnp.zeros((1, Hp), jnp.float32)
    b1_packed = b1_packed.at[0, :H].set(b1u.reshape(H).astype(jnp.float32))
    b1_packed = b1_packed.at[0, H:2 * H].set(b1p.reshape(H).astype(jnp.float32))
    b1_packed = b1_packed.at[0, 2 * H].set(1.0)             # bias col: relu(1)=1

    w2_packed = jnp.zeros((1, Hp), jnp.float32)
    w2_packed = w2_packed.at[0, :H].set(w2u.reshape(H).astype(jnp.float32))
    w2_packed = w2_packed.at[0, H:2 * H].set(w2p.reshape(H).astype(jnp.float32))
    w2_packed = w2_packed.at[0, 2 * H].set(
        (b2u.reshape(()) + b2p.reshape(())).astype(jnp.float32))

    # ---- optional narrow activations (halves dominant HBM traffic) ---------
    if act_dtype is not None:
        beliefs = beliefs.astype(act_dtype)
        pots = pots.astype(act_dtype)
    act_dt = beliefs.dtype
    w_top = w_top.astype(act_dt)     # match matmul operand dtype; f32 accumulate
    w_bot = w_bot.astype(act_dt)

    # ---- batch tiling -------------------------------------------------------
    # tb is a multiple of 128 (lane-dense output blocks); for large batches the
    # tile is capped so the grid keeps >= ~4 steps (lets ("parallel",) shard
    # across v7x's two TensorCores); small batches pad up to one 128-row tile.
    tb_cap = max(128, (int(block_b) // 128) * 128)
    Bq = _round_up(B, 128)
    tb = min(tb_cap, max(128, 128 * _cdiv(Bq, 4 * 128)))
    tb = min(tb, Bq)
    Bp = _round_up(B, tb)
    grid_n = Bp // tb

    if Bp != B:  # zero-padded rows compute garbage that is sliced off below
        pad = ((0, Bp - B), (0, 0))
        beliefs = jnp.pad(beliefs, pad)
        pots = jnp.pad(pots, pad)

    act_spec = pl.BlockSpec((tb, T), lambda i: (i, 0))

    def resident(a):  # weights stay VMEM-resident (block index never changes)
        return pl.BlockSpec(a.shape, lambda i: (0, 0))

    out = pl.pallas_call(
        _fused_split_t_kernel,
        out_shape=jax.ShapeDtypeStruct((1, Bp), jnp.float32),
        grid=(grid_n,),
        in_specs=[act_spec, act_spec,
                  resident(w_top), resident(w_bot),
                  resident(b1_packed), resident(w2_packed)],
        out_specs=pl.BlockSpec((1, tb), lambda i: (0, i)),   # lane-dense slab
        compiler_params=pltpu.CompilerParams(
            dimension_semantics=("parallel",)),
    )(beliefs, pots, w_top, w_bot, b1_packed, w2_packed)

    return out[0, :B]


# ----------------------------------------------------------------------------
# Deterministic parameter construction (synthetic init, no checkpoint load)
# ----------------------------------------------------------------------------
def make_mlp_params(key, d_in, hidden):
    k1, k2 = jax.random.split(key)
    w1 = (jax.random.normal(k1, (d_in, hidden), jnp.float32)
          / jnp.sqrt(jnp.float32(d_in)))
    b1 = jnp.zeros((1, hidden), jnp.float32)
    w2 = (jax.random.normal(k2, (hidden, 1), jnp.float32)
          / jnp.sqrt(jnp.float32(hidden)))
    b2 = jnp.zeros((1, 1), jnp.float32)
    return (w1, b1, w2, b2)


def _ref_forward(beliefs, pots, unary_params, pair_params, U):
    """Pure-JAX reference identical to the PyTorch module's math."""
    def mlp(x, w1, b1, w2, b2):
        return jnp.maximum(x @ w1 + b1.reshape(1, -1), 0.0) @ w2 + b2.reshape(1, 1)
    xu = jnp.concatenate([beliefs[:, :U], pots[:, :U]], axis=1)
    xp = jnp.concatenate([beliefs[:, U:], pots[:, U:]], axis=1)
    return (mlp(xu, *unary_params) + mlp(xp, *pair_params))[:, 0]


if __name__ == "__main__":
    # Problem sizes consistent with the module's __init__:
    #   num_nodes=4, num_vals=4 -> U = 16 ; pairs = 3 -> P = 4*4*3 = 48 ; T = 64
    num_nodes, num_vals, num_pairs = 4, 4, 3
    U = num_nodes * num_vals                       # 16
    Pnum = num_vals * num_vals * num_pairs         # 48
    T = U + Pnum                                   # 64
    hidden = 32

    key = jax.random.PRNGKey(0)
    k_bel, k_pot, k_inp, k_u, k_p, k_b1, k_b2 = jax.random.split(key, 7)

    unary_params = make_mlp_params(k_u, 2 * U, hidden)
    pair_params = make_mlp_params(k_p, 2 * Pnum, hidden)

    # ---- small batch (single padded grid step), f32 ------------------------
    batch = 2
    beliefs = jax.random.uniform(k_bel, (batch, T), jnp.float32)
    pots = jax.random.normal(k_pot, (batch, T), jnp.float32)
    inputs = jax.random.normal(k_inp, (batch, 8), jnp.float32)  # unused by MLP

    obj = jax.block_until_ready(
        input_split_t_model_v2(beliefs, pots, inputs,
                               unary_params, pair_params, U))
    ref = _ref_forward(beliefs, pots, unary_params, pair_params, U)
    assert obj.shape == (batch,)
    assert jnp.allclose(obj, ref, atol=1e-4, rtol=1e-4)

    # ---- larger batch: padded + 3 grid steps, f32 --------------------------
    big_b = 300
    beliefs_b = jax.random.uniform(k_b1, (big_b, T), jnp.float32)
    pots_b = jax.random.normal(k_b2, (big_b, T), jnp.float32)
    obj_b = jax.block_until_ready(
        input_split_t_model_v2(beliefs_b, pots_b, None,
                               unary_params, pair_params, U, block_b=128))
    ref_b = _ref_forward(beliefs_b, pots_b, unary_params, pair_params, U)
    assert obj_b.shape == (big_b,)
    assert jnp.allclose(obj_b, ref_b, atol=1e-4, rtol=1e-4)

    # ---- bf16-activation path (v6e/v7x bandwidth optimization) -------------
    obj_bf = jax.block_until_ready(
        input_split_t_model_v2(beliefs_b, pots_b, None,
                               unary_params, pair_params, U,
                               block_b=128, act_dtype=jnp.bfloat16))

    def _q(x):
        return x.astype(jnp.bfloat16).astype(jnp.float32)

    q_unary = (_q(unary_params[0]),) + unary_params[1:]
    q_pair = (_q(pair_params[0]),) + pair_params[1:]
    ref_bf = _ref_forward(_q(beliefs_b), _q(pots_b), q_unary, q_pair, U)
    assert obj_bf.shape == (big_b,)
    assert jnp.allclose(obj_bf, ref_bf, atol=5e-3, rtol=5e-3)

    print("KERNEL_OK")
</pallas_src>

<mosaic_0001>
module attributes {stable_mosaic.version = 11 : i64} {
  func.func @_fused_split_t_kernel(%arg0: i32, %arg1: memref<128x64xf32, #tpu.memory_space<vmem>>, %arg2: memref<128x64xf32, #tpu.memory_space<vmem>>, %arg3: memref<64x128xf32, #tpu.memory_space<vmem>>, %arg4: memref<64x128xf32, #tpu.memory_space<vmem>>, %arg5: memref<1x128xf32, #tpu.memory_space<vmem>>, %arg6: memref<1x128xf32, #tpu.memory_space<vmem>>, %arg7: memref<1x128xf32, #tpu.memory_space<vmem>>) attributes {dimension_semantics = [#tpu.dimension_semantics<parallel>], iteration_bounds = array<i64: 1>, scalar_prefetch = 0 : i64, scratch_operands = 0 : i64, tpu.core_type = #tpu.core_type<tc>, window_params = [{transform_indices = @transform_0, window_bounds = array<i64: 128, 64>}, {transform_indices = @transform_1, window_bounds = array<i64: 128, 64>}, {pipeline_mode = #tpu.pipeline_mode<synchronous>, transform_indices = @transform_2, window_bounds = array<i64: 64, 128>}, {pipeline_mode = #tpu.pipeline_mode<synchronous>, transform_indices = @transform_3, window_bounds = array<i64: 64, 128>}, {pipeline_mode = #tpu.pipeline_mode<synchronous>, transform_indices = @transform_4, window_bounds = array<i64: 1, 128>}, {pipeline_mode = #tpu.pipeline_mode<synchronous>, transform_indices = @transform_5, window_bounds = array<i64: 1, 128>}, {transform_indices = @transform_6, window_bounds = array<i64: 1, 128>}]} {
    %c0 = arith.constant 0 : index
    %c0_0 = arith.constant 0 : index
    %0 = vector.load %arg1[%c0, %c0_0] : memref<128x64xf32, #tpu.memory_space<vmem>>, vector<128x64xf32>
    %c0_1 = arith.constant 0 : index
    %c0_2 = arith.constant 0 : index
    %1 = vector.load %arg3[%c0_1, %c0_2] : memref<64x128xf32, #tpu.memory_space<vmem>>, vector<64x128xf32>
    %cst = arith.constant dense<0.000000e+00> : vector<128x128xf32>
    %2 = tpu.matmul %0, %1, %cst {dimension_numbers = #tpu.dot_dimension_numbers<[1], [0], [0], [1], [0, 0, 1, 1], [], []>} : vector<128x64xf32>, vector<64x128xf32>, vector<128x128xf32> -> vector<128x128xf32>
    %c0_3 = arith.constant 0 : index
    %c0_4 = arith.constant 0 : index
    %3 = vector.load %arg2[%c0_3, %c0_4] : memref<128x64xf32, #tpu.memory_space<vmem>>, vector<128x64xf32>
    %c0_5 = arith.constant 0 : index
    %c0_6 = arith.constant 0 : index
    %4 = vector.load %arg4[%c0_5, %c0_6] : memref<64x128xf32, #tpu.memory_space<vmem>>, vector<64x128xf32>
    %cst_7 = arith.constant dense<0.000000e+00> : vector<128x128xf32>
    %5 = tpu.matmul %3, %4, %cst_7 {dimension_numbers = #tpu.dot_dimension_numbers<[1], [0], [0], [1], [0, 0, 1, 1], [], []>} : vector<128x64xf32>, vector<64x128xf32>, vector<128x128xf32> -> vector<128x128xf32>
    %6 = arith.addf %2, %5 : vector<128x128xf32>
    %c0_8 = arith.constant 0 : index
    %c0_9 = arith.constant 0 : index
    %7 = vector.load %arg5[%c0_8, %c0_9] : memref<1x128xf32, #tpu.memory_space<vmem>>, vector<1x128xf32>
    %8 = vector.broadcast %7 : vector<1x128xf32> to vector<128x128xf32>
    %9 = arith.addf %6, %8 : vector<128x128xf32>
    %cst_10 = arith.constant 0.000000e+00 : f32
    %10 = vector.broadcast %cst_10 : f32 to vector<128x128xf32>
    %11 = arith.maximumf %9, %10 : vector<128x128xf32>
    %c0_11 = arith.constant 0 : index
    %c0_12 = arith.constant 0 : index
    %12 = vector.load %arg6[%c0_11, %c0_12] : memref<1x128xf32, #tpu.memory_space<vmem>>, vector<1x128xf32>
    %13 = tpu.transpose %11, [1, 0] : vector<128x128xf32> -> vector<128x128xf32>
    %cst_13 = arith.constant dense<0.000000e+00> : vector<1x128xf32>
    %14 = tpu.matmul %12, %13, %cst_13 {dimension_numbers = #tpu.dot_dimension_numbers<[1], [0], [0], [1], [0, 0, 1, 1], [], []>} : vector<1x128xf32>, vector<128x128xf32>, vector<1x128xf32> -> vector<1x128xf32>
    %c0_14 = arith.constant 0 : index
    %c0_15 = arith.constant 0 : index
    %15 = vector.load %arg7[%c0_14, %c0_15] : memref<1x128xf32, #tpu.memory_space<vmem>>, vector<1x128xf32>
    tpu.vector_store %arg7[%c0_14, %c0_15], %14 {strides = array<i32>} : memref<1x128xf32, #tpu.memory_space<vmem>>, vector<1x128xf32>,
    return
  }
  func.func @transform_0(%arg0: i32) -> (i32, i32) {
    %c0_i32 = arith.constant 0 : i32
    %c0_i32_0 = arith.constant 0 : i32
    return %arg0, %c0_i32 : i32, i32
  }
  func.func @transform_1(%arg0: i32) -> (i32, i32) {
    %c0_i32 = arith.constant 0 : i32
    %c0_i32_0 = arith.constant 0 : i32
    return %arg0, %c0_i32 : i32, i32
  }
  func.func @transform_2(%arg0: i32) -> (i32, i32) {
    %c0_i32 = arith.constant 0 : i32
    %c0_i32_0 = arith.constant 0 : i32
    %c0_i32_1 = arith.constant 0 : i32
    return %c0_i32, %c0_i32_0 : i32, i32
  }
  func.func @transform_3(%arg0: i32) -> (i32, i32) {
    %c0_i32 = arith.constant 0 : i32
    %c0_i32_0 = arith.constant 0 : i32
    %c0_i32_1 = arith.constant 0 : i32
    return %c0_i32, %c0_i32_0 : i32, i32
  }
  func.func @transform_4(%arg0: i32) -> (i32, i32) {
    %c0_i32 = arith.constant 0 : i32
    %c0_i32_0 = arith.constant 0 : i32
    %c0_i32_1 = arith.constant 0 : i32
    return %c0_i32, %c0_i32_0 : i32, i32
  }
  func.func @transform_5(%arg0: i32) -> (i32, i32) {
    %c0_i32 = arith.constant 0 : i32
    %c0_i32_0 = arith.constant 0 : i32
    %c0_i32_1 = arith.constant 0 : i32
    return %c0_i32, %c0_i32_0 : i32, i32
  }
  func.func @transform_6(%arg0: i32) -> (i32, i32) {
    %c0_i32 = arith.constant 0 : i32
    %c0_i32_0 = arith.constant 0 : i32
    return %c0_i32, %arg0 : i32, i32
  }
}

</mosaic_0001>

<bundles_post_ra>
// kernel: tpu_custom_call.1
= control target key start
LH: loop header
LB: loop body
LE: loop exit
PB: predicated region body
PF: predicated region fallthrough
CT: control target
= control target key end

     0   :  { %vm72_vm0 = vcmask 523264   ;;  %s1104_s0 = inlined_call_operand.vmem [shape: f32[128,64], index: 0, kind: input, shape index: {}]   ;;  %s1105_s1 = inlined_call_operand.vmem [shape: f32[128,64], index: 1, kind: input, shape index: {}]   ;;  %s1106_s2 = inlined_call_operand.vmem [shape: f32[64,128], index: 2, kind: input, shape index: {}]   ;;  %s1107_s3 = inlined_call_operand.vmem [shape: f32[64,128], index: 3, kind: input, shape index: {}]   ;;  %s1108_s4 = inlined_call_operand.vmem [shape: f32[1,128], index: 4, kind: input, shape index: {}]   ;;  %s1109_s5 = inlined_call_operand.vmem [shape: f32[1,128], index: 5, kind: input, shape index: {}]   ;;  %s1110_s6 = inlined_call_operand.hbm [shape: f32[1,128], index: 6, kind: output, shape index: {}]  }
   0x1   :  { %v71_v0 = vld [vmem:[%s1107_s3 + $0x38] sm:$0xff]  ;;  %v70_v1 = vld [vmem:[%s1107_s3 + $0x30] sm:$0xff]  ;;  %v69_v2 = vld [vmem:[%s1107_s3 + $0x28] sm:$0xff] }
   0x2   :  { %682 = vmatprep.subr.mxu1 %v71_v0  ;;  %v48_v3 = vld [vmem:[%s1105_s1] sm:$0xff]  ;;  %v67_v5 = vld [vmem:[%s1107_s3 + $0x18] sm:$0xff]  ;;  %v66_v6 = vld [vmem:[%s1107_s3 + $0x10] sm:$0xff] }
   0x3   :  { %683 = vmatpush3.msra.mxu1 %v71_v0  ;;  %698 = vmatprep.mubr.msk.f32.mxu1 %vm72_vm0, %v48_v3  ;;  %v68_v4 = vld [vmem:[%s1107_s3 + $0x20] sm:$0xff]  ;;  %v65_v7 = vld [vmem:[%s1107_s3 + $0x8] sm:$0xff]  ;;  %v47_v10 = vld [vmem:[%s1106_s2 + $0x38] sm:$0xff] }
   0x4   :  { %684 = vmatprep.subr.mxu1 %v70_v1  ;;  %v64_v8 = vld [vmem:[%s1107_s3] sm:$0xff]  ;;  %v49_v9 = vld [vmem:[%s1105_s1 + $0x8] sm:$0xff]  ;;  %v50_v11 = vld [vmem:[%s1105_s1 + $0x10] sm:$0xff] }
   0x5   :  { %685 = vmatpush3.msra.mxu1 %v70_v1  ;;  %v46_v12 = vld [vmem:[%s1106_s2 + $0x30] sm:$0xff] }
   0x6   :  { %686 = vmatprep.subr.mxu1 %v69_v2 }
   0x7   :  { %687 = vmatpush3.msra.mxu1 %v69_v2 }
   0x8   :  { %688 = vmatprep.subr.mxu1 %v68_v4 }
   0x9   :  { %689 = vmatpush3.msra.mxu1 %v68_v4 }
   0xa   :  { %690 = vmatprep.subr.mxu1 %v67_v5 }
   0xb   :  { %691 = vmatpush3.msra.mxu1 %v67_v5 }
   0xc   :  { %692 = vmatprep.subr.mxu1 %v66_v6 }
   0xd   :  { %693 = vmatpush3.msra.mxu1 %v66_v6 }
   0xe   :  { %694 = vmatprep.subr.mxu1 %v65_v7 }
   0xf   :  { %695 = vmatpush3.msra.mxu1 %v65_v7 }
  0x10   :  { %696 = vmatprep.subr.mxu1 %v64_v8 }
  0x11   :  { %697 = vmatpush3.msra.mxu1 %v64_v8 }
  0x12   :  { %11 = vsyncpa [#allocation3], 0  ;;  %699 = vmatmul.mubr.msk.f32.vlgmr.msra.gmra.mxu1 %vm72_vm0, %v49_v9  ;;  %722 = vmatprep.subr.mxu1 %v47_v10  ;;  %v51_v13 = vld [vmem:[%s1105_s1 + $0x18] sm:$0xff]  ;;  %v45_v14 = vld [vmem:[%s1106_s2 + $0x28] sm:$0xff]  ;;  %v822_v48 = vmov 0.0   ;;  %vm823_vm1 = vmmov 0  }
  0x13   :  { %723 = vmatpush3.msra.mxu1 %v47_v10  ;;  %701 = vmatprep.mubr.msk.f32.mxu1 %vm72_vm0, %v50_v11  ;;  %v52_v15 = vld [vmem:[%s1105_s1 + $0x20] sm:$0xff]  ;;  %v53_v17 = vld [vmem:[%s1105_s1 + $0x28] sm:$0xff]  ;;  %v43_v18 = vld [vmem:[%s1106_s2 + $0x18] sm:$0xff]  ;;  %s824_s16 = smov [#allocation2]  }
  0x14   :  { %724 = vmatprep.subr.mxu1 %v46_v12  ;;  %v44_v16 = vld [vmem:[%s1106_s2 + $0x20] sm:$0xff]  ;;  %v54_v19 = vld [vmem:[%s1105_s1 + $0x30] sm:$0xff]  ;;  %v55_v21 = vld [vmem:[%s1105_s1 + $0x38] sm:$0xff]  ;;  %762 = vmatprep.subr.mxu0 %v822_v48  ;;  %s576_s17 = sshll.u32 %s824_s16, 4  ;;  %s577_s17 = int_to_ptr.vmem [resolvable:$true] %s576_s17 }
  0x15   :  { %725 = vmatpush3.msra.mxu1 %v46_v12  ;;  %v42_v20 = vld [vmem:[%s1106_s2 + $0x10] sm:$0xff]  ;;  %v41_v22 = vld [vmem:[%s1106_s2 + $0x8] sm:$0xff]  ;;  %v56_v23 = vld [vmem:[%s1105_s1 + $0x40] sm:$0xff]  ;;  %794 = vmatprep.mubr.msk.f32.mxu0 %vm823_vm1, %v822_v48  ;;  %s800_s18 = scalar_lea.vmem %s577_s17, 16  ;;  %s804_s19 = scalar_lea.vmem %s577_s17, 32 }
  0x16   :  { %702 = vmatmul.mubr.msk.f32.gmra.mxu1 %vm72_vm0, %v51_v13  ;;  %726 = vmatprep.subr.mxu1 %v45_v14  ;;  %v40_v24 = vld [vmem:[%s1106_s2] sm:$0xff]  ;;  %v57_v25 = vld [vmem:[%s1105_s1 + $0x48] sm:$0xff]  ;;  %v58_v26 = vld [vmem:[%s1105_s1 + $0x50] sm:$0xff]  ;;  %p801_p0 = scmp.ne.s32.totalorder %s577_s17, %s800_s18  ;;  %p805_p1 = scmp.lt.s32.totalorder %s577_s17, %s577_s17 }
  0x17   :  { %704 = vmatprep.mubr.msk.f32.mxu1 %vm72_vm0, %v52_v15  ;;  %727 = vmatpush3.msra.mxu1 %v45_v14  ;;  %v59_v27 = vld [vmem:[%s1105_s1 + $0x58] sm:$0xff]  ;;  %v60_v28 = vld [vmem:[%s1105_s1 + $0x60] sm:$0xff]  ;;  %v61_v29 = vld [vmem:[%s1105_s1 + $0x68] sm:$0xff]  ;;  %p806_p2 = scmp.lt.s32.totalorder %s804_s19, %s800_s18 }
  0x18   :  { %728 = vmatprep.subr.mxu1 %v44_v16  ;;  %v62_v30 = vld [vmem:[%s1105_s1 + $0x70] sm:$0xff]  ;;  %v63_v31 = vld [vmem:[%s1105_s1 + $0x78] sm:$0xff]  ;;  %v24_v32 = vld [vmem:[%s1104_s0] sm:$0xff] }
  0x19   :  { %729 = vmatpush3.msra.mxu1 %v44_v16  ;;  %v25_v33 = vld [vmem:[%s1104_s0 + $0x8] sm:$0xff]  ;;  %v26_v34 = vld [vmem:[%s1104_s0 + $0x10] sm:$0xff]  ;;  %v27_v35 = vld [vmem:[%s1104_s0 + $0x18] sm:$0xff]  ;;  %p807_p3 = por %p806_p2, %p805_p1 }
  0x1a   :  { %705 = vmatmul.mubr.msk.f32.gmra.mxu1 %vm72_vm0, %v53_v17  ;;  %730 = vmatprep.subr.mxu1 %v43_v18  ;;  %v28_v36 = vld [vmem:[%s1104_s0 + $0x20] sm:$0xff]  ;;  %v29_v37 = vld [vmem:[%s1104_s0 + $0x28] sm:$0xff]  ;;  %v30_v38 = vld [vmem:[%s1104_s0 + $0x30] sm:$0xff] }
  0x1b   :  { %707 = vmatprep.mubr.msk.f32.mxu1 %vm72_vm0, %v54_v19  ;;  %731 = vmatpush3.msra.mxu1 %v43_v18  ;;  %v31_v39 = vld [vmem:[%s1104_s0 + $0x38] sm:$0xff]  ;;  %v32_v40 = vld [vmem:[%s1104_s0 + $0x40] sm:$0xff]  ;;  %v33_v41 = vld [vmem:[%s1104_s0 + $0x48] sm:$0xff]  ;;  %p808_p4 = pnand %p807_p3, %p801_p0 }
  0x1c   :  { %732 = vmatprep.subr.mxu1 %v42_v20  ;;  %v34_v42 = vld [vmem:[%s1104_s0 + $0x50] sm:$0xff]  ;;  %v35_v43 = vld [vmem:[%s1104_s0 + $0x58] sm:$0xff]  ;;  %v36_v44 = vld [vmem:[%s1104_s0 + $0x60] sm:$0xff] }
  0x1d   :  { %733 = vmatpush3.msra.mxu1 %v42_v20  ;;  %v37_v45 = vld [vmem:[%s1104_s0 + $0x68] sm:$0xff]  ;;  %v38_v46 = vld [vmem:[%s1104_s0 + $0x70] sm:$0xff]  ;;  %v39_v47 = vld [vmem:[%s1104_s0 + $0x78] sm:$0xff] }
  0x1e   :  { %708 = vmatmul.mubr.msk.f32.gmra.mxu1 %vm72_vm0, %v55_v21  ;;  %734 = vmatprep.subr.mxu1 %v41_v22  ;;  %v1057_v21 = vld [vmem:[%s1108_s4] ss:$0 sm:$0xff] }
  0x1f   :  { %710 = vmatprep.mubr.msk.f32.mxu1 %vm72_vm0, %v56_v23  ;;  %735 = vmatpush3.msra.mxu1 %v41_v22 }
  0x20   :  { %736 = vmatprep.subr.mxu1 %v40_v24 }
  0x21   :  { %737 = vmatpush3.msra.mxu1 %v40_v24 }
  0x22   :  { %711 = vmatmul.mubr.msk.f32.gmra.mxu1 %vm72_vm0, %v57_v25 }
  0x23   :  { %713 = vmatprep.mubr.msk.f32.mxu1 %vm72_vm0, %v58_v26 }
  0x26   :  { %714 = vmatmul.mubr.msk.f32.gmra.mxu1 %vm72_vm0, %v59_v27 }
  0x27   :  { %716 = vmatprep.mubr.msk.f32.mxu1 %vm72_vm0, %v60_v28 }
  0x2a   :  { %717 = vmatmul.mubr.msk.f32.gmra.mxu1 %vm72_vm0, %v61_v29 }
  0x2b   :  { %719 = vmatprep.mubr.msk.f32.mxu1 %vm72_vm0, %v62_v30 }
  0x2e   :  { %720 = vmatmul.mubr.msk.f32.gmra.mxu1 %vm72_vm0, %v63_v31 }
  0x2f   :  { %738 = vmatprep.mubr.msk.f32.mxu1 %vm72_vm0, %v24_v32 }
  0x32   :  { %739 = vmatmul.mubr.msk.f32.vlgmr.msra.gmra.mxu1 %vm72_vm0, %v25_v33 }
  0x33   :  { %741 = vmatprep.mubr.msk.f32.mxu1 %vm72_vm0, %v26_v34 }
  0x36   :  { %742 = vmatmul.mubr.msk.f32.gmra.mxu1 %vm72_vm0, %v27_v35 }
  0x37   :  { %744 = vmatprep.mubr.msk.f32.mxu1 %vm72_vm0, %v28_v36 }
  0x3a   :  { %745 = vmatmul.mubr.msk.f32.gmra.mxu1 %vm72_vm0, %v29_v37 }
  0x3b   :  { %747 = vmatprep.mubr.msk.f32.mxu1 %vm72_vm0, %v30_v38 }
  0x3e   :  { %748 = vmatmul.mubr.msk.f32.gmra.mxu1 %vm72_vm0, %v31_v39 }
  0x3f   :  { %750 = vmatprep.mubr.msk.f32.mxu1 %vm72_vm0, %v32_v40 }
  0x42   :  { %751 = vmatmul.mubr.msk.f32.gmra.mxu1 %vm72_vm0, %v33_v41 }
  0x43   :  { %753 = vmatprep.mubr.msk.f32.mxu1 %vm72_vm0, %v34_v42 }
  0x46   :  { %754 = vmatmul.mubr.msk.f32.gmra.mxu1 %vm72_vm0, %v35_v43 }
  0x47   :  { %756 = vmatprep.mubr.msk.f32.mxu1 %vm72_vm0, %v36_v44 }
  0x4a   :  { %757 = vmatmul.mubr.msk.f32.gmra.mxu1 %vm72_vm0, %v37_v45 }
  0x4b   :  { %759 = vmatprep.mubr.msk.f32.mxu1 %vm72_vm0, %v38_v46 }
  0x4e   :  { %760 = vmatmul.mubr.msk.f32.gmra.mxu1 %vm72_vm0, %v39_v47 }
  0xd2   :  { %v700_v49 = vpop.f32.mrf.mxu1 }
  0xd4   :  { %v187_v50 = vpop.f32.mrf.mxu1 }
  0xd6   :  { %v703_v51 = vpop.f32.mrf.mxu1 }
  0xd8   :  { %v197_v52 = vpop.f32.mrf.mxu1 }
  0xda   :  { %v1038_v53 = vpop.f32.mrf.mxu1 }
  0xdc   :  { %v1040_v54 = vpop.f32.mrf.mxu1 }
  0xde   :  { %v1042_v55 = vpop.f32.mrf.mxu1 }
  0xe0   :  { %v1044_v56 = vpop.f32.mrf.mxu1 }
  0xe2   :  { %v712_v57 = vpop.f32.mrf.mxu1 }
  0xe4   :  { %v227_v58 = vpop.f32.mrf.mxu1 }
  0xe6   :  { %v715_v59 = vpop.f32.mrf.mxu1 }
  0xe8   :  { %v237_v60 = vpop.f32.mrf.mxu1 }
  0xea   :  { %v718_v61 = vpop.f32.mrf.mxu1 }
  0xec   :  { %v247_v62 = vpop.f32.mrf.mxu1 }
  0xee   :  { %v721_v63 = vpop.f32.mrf.mxu1 }
  0xf0   :  { %v257_v0 = vpop.f32.mrf.mxu1 }
  0xf2   :  { %v740_v1 = vpop.f32.mrf.mxu1 }
  0xf3   :  { %v1046_v2 = vadd.f32 %v740_v1, %v700_v49 }
  0xf4   :  { %v380_v3 = vpop.f32.mrf.mxu1 }
  0xf5   :  { %v1048_v4 = vadd.f32 %v380_v3, %v187_v50 }
  0xf6   :  { %v743_v5 = vpop.f32.mrf.mxu1 }
  0xf7   :  { %v1050_v6 = vadd.f32 %v743_v5, %v703_v51  ;;  %v466_v1 = vadd.f32 %v1057_v21, %v1048_v4  ;;  %v498_v5 = vld [vmem:[%s1109_s5] sm:$0x1] }
  0xf8   :  { %v390_v7 = vpop.f32.mrf.mxu1 }
  0xf9   :  { %v1052_v8 = vadd.f32 %v390_v7, %v197_v52  ;;  %v482_v3 = vmax.f32 %v466_v1, 0.0 }
  0xfa   :  { %v746_v9 = vpop.f32.mrf.mxu1 }
  0xfb   :  { %v406_v50 = vadd.f32 %v746_v9, %v1038_v53  ;;  %v469_v53 = vadd.f32 %v1057_v21, %v1050_v6 }
  0xfc   :  { %v400_v10 = vpop.f32.mrf.mxu1 }
  0xfe   :  { %v749_v11 = vpop.f32.mrf.mxu1 }
  0xff   :  { %v416_v43 = vadd.f32 %v749_v11, %v1042_v55  ;;  %v471_v55 = vadd.f32 %v1057_v21, %v406_v50 }
 0x100   :  { %v410_v12 = vpop.f32.mrf.mxu1 }
 0x101   :  { %v473_v46 = vadd.f32 %v1057_v21, %v416_v43  ;;  %v411_v47 = vadd.f32 %v410_v12, %v1044_v56  ;;  %v487_v56 = vmax.f32 %v471_v55, 0.0 }
 0x102   :  { %v752_v13 = vpop.f32.mrf.mxu1 }
 0x103   :  { %v426_v37 = vadd.f32 %v752_v13, %v712_v57  ;;  %v489_v51 = vmax.f32 %v473_v46, 0.0  ;;  %v472_v52 = vadd.f32 %v1057_v21, %v411_v47  ;;  %v401_v57 = vadd.f32 %v400_v10, %v1040_v54 }
 0x104   :  { %v420_v14 = vpop.f32.mrf.mxu1  ;;  %v468_v54 = vadd.f32 %v1057_v21, %v1052_v8 }
 0x105   :  { %v475_v40 = vadd.f32 %v1057_v21, %v426_v37  ;;  %v421_v41 = vadd.f32 %v420_v14, %v227_v58  ;;  %v488_v58 = vmax.f32 %v472_v52, 0.0 }
 0x106   :  { %v755_v15 = vpop.f32.mrf.mxu1 }
 0x107   :  { %v436_v31 = vadd.f32 %v755_v15, %v715_v59  ;;  %v491_v44 = vmax.f32 %v475_v40, 0.0  ;;  %v474_v45 = vadd.f32 %v1057_v21, %v421_v41  ;;  %v470_v59 = vadd.f32 %v1057_v21, %v401_v57 }
 0x108   :  { %v430_v16 = vpop.f32.mrf.mxu1 }
 0x109   :  { %v477_v34 = vadd.f32 %v1057_v21, %v436_v31  ;;  %v431_v35 = vadd.f32 %v430_v16, %v237_v60  ;;  %v490_v49 = vmax.f32 %v474_v45, 0.0  ;;  %v486_v60 = vmax.f32 %v470_v59, 0.0 }
 0x10a   :  { %v758_v17 = vpop.f32.mrf.mxu1 }
 0x10b   :  { %v446_v25 = vadd.f32 %v758_v17, %v718_v61  ;;  %v493_v38 = vmax.f32 %v477_v34, 0.0  ;;  %v476_v39 = vadd.f32 %v1057_v21, %v431_v35  ;;  %v485_v61 = vmax.f32 %v469_v53, 0.0 }
 0x10c   :  { %v440_v18 = vpop.f32.mrf.mxu1 }
 0x10d   :  { %v479_v28 = vadd.f32 %v1057_v21, %v446_v25  ;;  %v441_v29 = vadd.f32 %v440_v18, %v247_v62  ;;  %v492_v42 = vmax.f32 %v476_v39, 0.0  ;;  %v467_v62 = vadd.f32 %v1057_v21, %v1046_v2 }
 0x10e   :  { %v761_v19 = vpop.f32.mrf.mxu1 }
 0x10f   :  { %v456_v20 = vadd.f32 %v761_v19, %v721_v63  ;;  %v495_v32 = vmax.f32 %v479_v28, 0.0  ;;  %v478_v33 = vadd.f32 %v1057_v21, %v441_v29  ;;  %v484_v63 = vmax.f32 %v468_v54, 0.0 }
 0x110   :  { %v450_v22 = vpop.f32.mrf.mxu1 }
 0x111   :  { %v451_v23 = vadd.f32 %v450_v22, %v257_v0  ;;  %v481_v24 = vadd.f32 %v1057_v21, %v456_v20  ;;  %v494_v36 = vmax.f32 %v478_v33, 0.0  ;;  %v483_v0 = vmax.f32 %v467_v62, 0.0 }
 0x113   :  { %v480_v26 = vadd.f32 %v1057_v21, %v451_v23  ;;  %v497_v27 = vmax.f32 %v481_v24, 0.0 }
 0x115   :  { %763 = vmatpush3.xpose.msra.mxu0 %v497_v27  ;;  %v496_v30 = vmax.f32 %v480_v26, 0.0 }
 0x116   :  { %764 = vmatprep.subr.mxu0 %v822_v48 }
 0x119   :  { %765 = vmatpush3.xpose.msra.mxu0 %v496_v30 }
 0x11a   :  { %766 = vmatprep.subr.mxu0 %v822_v48 }
 0x11d   :  { %767 = vmatpush3.xpose.msra.mxu0 %v495_v32 }
 0x11e   :  { %768 = vmatprep.subr.mxu0 %v822_v48 }
 0x121   :  { %769 = vmatpush3.xpose.msra.mxu0 %v494_v36 }
 0x122   :  { %770 = vmatprep.subr.mxu0 %v822_v48 }
 0x125   :  { %771 = vmatpush3.xpose.msra.mxu0 %v493_v38 }
 0x126   :  { %772 = vmatprep.subr.mxu0 %v822_v48 }
 0x129   :  { %773 = vmatpush3.xpose.msra.mxu0 %v492_v42 }
 0x12a   :  { %774 = vmatprep.subr.mxu0 %v822_v48 }
 0x12d   :  { %775 = vmatpush3.xpose.msra.mxu0 %v491_v44 }
 0x12e   :  { %776 = vmatprep.subr.mxu0 %v822_v48 }
 0x131   :  { %777 = vmatpush3.xpose.msra.mxu0 %v490_v49 }
 0x132   :  { %778 = vmatprep.subr.mxu0 %v822_v48 }
 0x135   :  { %779 = vmatpush3.xpose.msra.mxu0 %v489_v51 }
 0x136   :  { %780 = vmatprep.subr.mxu0 %v822_v48 }
 0x139   :  { %781 = vmatpush3.xpose.msra.mxu0 %v488_v58 }
 0x13a   :  { %782 = vmatprep.subr.mxu0 %v822_v48 }
 0x13d   :  { %783 = vmatpush3.xpose.msra.mxu0 %v487_v56 }
 0x13e   :  { %784 = vmatprep.subr.mxu0 %v822_v48 }
 0x141   :  { %785 = vmatpush3.xpose.msra.mxu0 %v486_v60 }
 0x142   :  { %786 = vmatprep.subr.mxu0 %v822_v48 }
 0x145   :  { %787 = vmatpush3.xpose.msra.mxu0 %v485_v61 }
 0x146   :  { %788 = vmatprep.subr.mxu0 %v822_v48 }
 0x149   :  { %789 = vmatpush3.xpose.msra.mxu0 %v484_v63 }
 0x14a   :  { %790 = vmatprep.subr.mxu0 %v822_v48 }
 0x14d   :  { %791 = vmatpush3.xpose.msra.mxu0 %v483_v0 }
 0x14e   :  { %792 = vmatprep.subr.mxu0 %v822_v48 }
 0x151   :  { %793 = vmatpush3.xpose.msra.mxu0 %v482_v3 }
 0x154   :  { %795 = vmatmul.mubr.f32.vlgmr.msra.gmra.mxu0 %v498_v5 }
 0x214   :  { %v565_v2 = vpop.f32.mrf.mxu0 }
 0x215   :  { %569 = vst [vmem:[#allocation2] sm:$0x1] %v565_v2 }
 0x216   :  { %v796_v6 = vpop.f32.mrf.mxu0 }
 0x217   :  { %811 = shalt.err (!%p808_p4)
}
 0x218   :  { %579 = dma.vmem_to_hbm [thread:$0]  %s577_s17, 16, %s1110_s6, [#allocation3]  }
 0x219   :  { %820 = dma.done.wait [#allocation3], 16  }
 0x21a   :  { %821 = vsyncadd [#allocation3], 4294967280 }
 0x21b   :  { %583 = vsyncpa [#allocation3], 1 }

</bundles_post_ra>
